<compile_context>
chip_gen: v5e
topology: v5e:2x2
jax: 0.10.0
libtpu: 0.0.40
codegen_flags: <defaults>
</compile_context>

<pallas_src>
import functools
import math

import jax
import jax.numpy as jnp
from jax.experimental import pallas as pl
from jax.experimental.pallas import tpu as pltpu

EPS = 1e-5


def _round_up(x, m):
    return (x + m - 1) // m * m


def _vmem_capacity_bytes():
    try:
        return int(pltpu.get_tpu_info().vmem_capacity_bytes)
    except Exception:
        return 64 * 1024 * 1024  # conservative fallback (v7x per-core VMEM)


def _fold_and_affine(s, sq, w, b, *, k, D, n_valid):
    """(1, Dp) sum / sumsq + (1, D) gamma/beta -> (1, Dp) scale/shift."""
    col_s = s[:, 0:D]
    col_sq = sq[:, 0:D]
    for g in range(1, k):                       # fold packed lane groups -> D features
        col_s = col_s + s[:, g * D:(g + 1) * D]
        col_sq = col_sq + sq[:, g * D:(g + 1) * D]
    inv_n = 1.0 / n_valid
    mean = col_s * inv_n
    var = jnp.maximum(col_sq * inv_n - mean * mean, 0.0)    # biased variance
    inv_std = jax.lax.rsqrt(var + EPS)
    scale = w.astype(jnp.float32) * inv_std                 # gamma / sqrt(var+eps)
    shift = b.astype(jnp.float32) - mean * scale            # beta - mean*scale
    if k > 1:                                               # tile back to packed width
        scale = jnp.concatenate([scale] * k, axis=1)
        shift = jnp.concatenate([shift] * k, axis=1)
    return scale, shift


# --------------------- single-call fast path (tensor fits in VMEM) -----------

def _fused_kernel(x_ref, w_ref, b_ref, o_ref, *, k, D, n_valid):
    x = x_ref[...].astype(jnp.float32)
    s = jnp.sum(x, axis=0, keepdims=True)
    sq = jnp.sum(x * x, axis=0, keepdims=True)
    scale, shift = _fold_and_affine(s, sq, w_ref[...], b_ref[...],
                                    k=k, D=D, n_valid=n_valid)
    o_ref[...] = (x * scale + shift).astype(o_ref.dtype)


# --------------------- two-pass streaming path --------------------------------

def _stats_kernel(x_ref, sums_ref, *, tile_n, tiles_per_shard, n_rows, needs_mask):
    i = pl.program_id(1)

    @pl.when(i == 0)
    def _():
        sums_ref[...] = jnp.zeros_like(sums_ref)

    x = x_ref[...].astype(jnp.float32)
    if needs_mask:
        # Mask rows past the end of the array (ragged / fully-OOB last tiles).
        t = pl.program_id(0) * tiles_per_shard + i
        row = t * tile_n + jax.lax.broadcasted_iota(jnp.int32, x.shape, 0)
        x = jnp.where(row < n_rows, x, 0.0)
    s = jnp.sum(x, axis=0, keepdims=True)
    sq = jnp.sum(x * x, axis=0, keepdims=True)
    sums_ref[0:1, 0:1, :] += s.reshape(1, 1, -1)
    sums_ref[0:1, 1:2, :] += sq.reshape(1, 1, -1)


def _normalize_kernel(x_ref, sums_ref, w_ref, b_ref, o_ref, *, k, D, n_valid):
    sums = jnp.sum(sums_ref[...], axis=0)      # fold per-core partials -> (2, Dp)
    scale, shift = _fold_and_affine(sums[0:1, :], sums[1:2, :],
                                    w_ref[...], b_ref[...],
                                    k=k, D=D, n_valid=n_valid)
    x = x_ref[...].astype(jnp.float32)
    o_ref[...] = (x * scale + shift).astype(o_ref.dtype)


def batch_normalization(x, weight, bias, *, force_two_pass=False, max_tile_rows=None):
    """x: (B, S, D); weight, bias: (D,). Returns (B, S, D)."""
    B, S, D = x.shape
    N = B * S
    in_dtype = x.dtype
    itemsize = jnp.dtype(in_dtype).itemsize

    # ---- lane packing: Dp = lcm(D, 128), always a multiple of 128 lanes.
    k = 1 if D % 128 == 0 else 128 // math.gcd(D, 128)
    Dp = k * D

    x2d = x.reshape(N, D)
    N_pad = _round_up(N, k)
    if N_pad != N:
        # Zero rows contribute 0 to sum/sumsq; we always divide by the true N.
        x2d = jnp.pad(x2d, ((0, N_pad - N), (0, 0)))
    Np = N_pad // k
    xp = x2d.reshape(Np, Dp)                    # free reshape (row-major)

    w2 = weight.reshape(1, D).astype(jnp.float32)
    b2 = bias.reshape(1, D).astype(jnp.float32)

    # ---- generation-aware VMEM budget
    vmem_cap = _vmem_capacity_bytes()
    vmem_limit = int(min(vmem_cap * 3 // 4, 100 * 1024 * 1024))
    x_bytes = Np * Dp * itemsize

    # ---- fast path: one kernel, x read from HBM exactly once
    fast_limit = min(vmem_cap // 8, 8 * 1024 * 1024)
    if not force_two_pass and x_bytes <= fast_limit:
        yp = pl.pallas_call(
            functools.partial(_fused_kernel, k=k, D=D, n_valid=float(N)),
            out_shape=jax.ShapeDtypeStruct((Np, Dp), in_dtype),
            grid_spec=pltpu.PrefetchScalarGridSpec(
                num_scalar_prefetch=0,
                grid=(1,),
                in_specs=[pl.BlockSpec((Np, Dp), lambda i: (0, 0)),
                          pl.BlockSpec((1, D), lambda i: (0, 0)),
                          pl.BlockSpec((1, D), lambda i: (0, 0))],
                out_specs=pl.BlockSpec((Np, Dp), lambda i: (0, 0)),
            ),
            compiler_params=pltpu.CompilerParams(
                dimension_semantics=("arbitrary",),
                vmem_limit_bytes=vmem_limit),
            cost_estimate=pl.CostEstimate(
                flops=5 * Np * Dp, transcendentals=D,
                bytes_accessed=2 * x_bytes),
        )(xp, w2, b2)
    else:
        # ---- row tiling: ~4 MiB tiles (amortizes the ~0.35 us grid-step cost)
        sublane = 8 if itemsize >= 4 else (16 if itemsize == 2 else 32)
        tile_bytes_target = 4 * 1024 * 1024
        rows_per_tile = max(sublane,
                            (tile_bytes_target // (Dp * itemsize)) // sublane * sublane)
        rows_per_tile = min(rows_per_tile, 4096)
        if max_tile_rows is not None:
            rows_per_tile = max(sublane, min(rows_per_tile, max_tile_rows))
        tile_n = Np if Np <= rows_per_tile else rows_per_tile
        num_tiles = (Np + tile_n - 1) // tile_n

        # split the stats pass across 2 cores (v7x megacore) when enough work
        num_shards = 2 if num_tiles >= 4 else 1
        tps = (num_tiles + num_shards - 1) // num_shards
        needs_mask = (num_shards * tps * tile_n) != Np

        # ---- pass 1: streamed per-column sum / sumsq (per-shard partials)
        sums = pl.pallas_call(
            functools.partial(_stats_kernel, tile_n=tile_n, tiles_per_shard=tps,
                              n_rows=Np, needs_mask=needs_mask),
            out_shape=jax.ShapeDtypeStruct((num_shards, 2, Dp), jnp.float32),
            grid_spec=pltpu.PrefetchScalarGridSpec(
                num_scalar_prefetch=0,
                grid=(num_shards, tps),
                in_specs=[pl.BlockSpec(
                    (tile_n, Dp),
                    # clamp: fully-OOB tiles re-read the last block; the kernel
                    # mask zeroes their contribution.
                    lambda c, i: (jnp.minimum(c * tps + i, num_tiles - 1), 0))],
                out_specs=pl.BlockSpec((1, 2, Dp), lambda c, i: (c, 0, 0)),
            ),
            compiler_params=pltpu.CompilerParams(
                dimension_semantics=("parallel", "arbitrary"),
                vmem_limit_bytes=vmem_limit),
            cost_estimate=pl.CostEstimate(
                flops=3 * Np * Dp, transcendentals=0,
                bytes_accessed=x_bytes + num_shards * 2 * Dp * 4),
        )(xp)

        # ---- pass 2: normalize; finalize (mean/var/scale/shift) fused in-kernel
        yp = pl.pallas_call(
            functools.partial(_normalize_kernel, k=k, D=D, n_valid=float(N)),
            out_shape=jax.ShapeDtypeStruct((Np, Dp), in_dtype),
            grid_spec=pltpu.PrefetchScalarGridSpec(
                num_scalar_prefetch=0,
                grid=(num_tiles,),
                in_specs=[
                    pl.BlockSpec((tile_n, Dp), lambda i: (i, 0)),
                    pl.BlockSpec((num_shards, 2, Dp), lambda i: (0, 0, 0)),
                    pl.BlockSpec((1, D), lambda i: (0, 0)),
                    pl.BlockSpec((1, D), lambda i: (0, 0)),
                ],
                out_specs=pl.BlockSpec((tile_n, Dp), lambda i: (i, 0)),
            ),
            compiler_params=pltpu.CompilerParams(
                dimension_semantics=("parallel",),
                vmem_limit_bytes=vmem_limit),
            cost_estimate=pl.CostEstimate(
                flops=2 * Np * Dp, transcendentals=num_tiles * D,
                bytes_accessed=2 * x_bytes),
        )(xp, sums, w2, b2)

    # unpack / unpad back to (B, S, D)
    y2d = yp.reshape(N_pad, D)
    if N_pad != N:
        y2d = y2d[:N]
    return y2d.reshape(B, S, D)


class Normalization:
    """JAX/Pallas port of the PyTorch Normalization module (batch mode)."""

    def __init__(self, embed_dim, key, normalization="batch"):
        assert normalization == "batch", "only 'batch' implemented here"
        # init_parameters(): uniform(-stdv, stdv) with stdv = 1/sqrt(last dim)
        stdv = 1.0 / math.sqrt(embed_dim)
        kw, kb = jax.random.split(key)
        self.weight = jax.random.uniform(
            kw, (embed_dim,), jnp.float32, minval=-stdv, maxval=stdv)
        self.bias = jax.random.uniform(
            kb, (embed_dim,), jnp.float32, minval=-stdv, maxval=stdv)

    def __call__(self, x, mask=None):
        return batch_normalization(x, self.weight, self.bias)


def _reference(x, weight, bias):
    B, S, D = x.shape
    x2d = x.reshape(-1, D).astype(jnp.float32)
    mean = jnp.mean(x2d, axis=0, keepdims=True)
    var = jnp.mean((x2d - mean) ** 2, axis=0, keepdims=True)
    y = (x2d - mean) / jnp.sqrt(var + EPS) * weight + bias
    return y.reshape(B, S, D).astype(x.dtype)


if __name__ == "__main__":
    key = jax.random.PRNGKey(0)
    k_x, k_p, k_x2, k_p2, k_x3, k_p3 = jax.random.split(key, 6)

    # 1) small shape, lane-packed (D=32 -> k=4), fused single-call fast path.
    B, S, D = 2, 8, 32
    x = jax.random.normal(k_x, (B, S, D), jnp.float32)
    norm = Normalization(D, key=k_p, normalization="batch")
    out = jax.block_until_ready(norm(x))
    ref = _reference(x, norm.weight, norm.bias)
    assert out.shape == x.shape and out.dtype == x.dtype
    assert jnp.max(jnp.abs(out - ref)) < 2e-4

    # 2) lane-dense D=128, still the fast path.
    B2, S2, D2 = 2, 600, 128
    x2 = jax.random.normal(k_x2, (B2, S2, D2), jnp.float32)
    norm2 = Normalization(D2, key=k_p2, normalization="batch")
    out2 = jax.block_until_ready(norm2(x2))
    ref2 = _reference(x2, norm2.weight, norm2.bias)
    assert out2.shape == x2.shape
    assert jnp.max(jnp.abs(out2 - ref2)) < 2e-4

    # 3) force the two-pass streamed path with small tiles: exercises the
    #    sharded stats pass, ragged last-tile masking and fused finalize.
    out2b = jax.block_until_ready(
        batch_normalization(x2, norm2.weight, norm2.bias,
                            force_two_pass=True, max_tile_rows=128))
    assert jnp.max(jnp.abs(out2b - ref2)) < 2e-4

    # 4) two-pass path with lane packing (D=64 -> k=2) and N not a multiple of k.
    B3, S3, D3 = 3, 333, 64
    x3 = jax.random.normal(k_x3, (B3, S3, D3), jnp.float32)
    norm3 = Normalization(D3, key=k_p3, normalization="batch")
    out3 = jax.block_until_ready(
        batch_normalization(x3, norm3.weight, norm3.bias,
                            force_two_pass=True, max_tile_rows=64))
    ref3 = _reference(x3, norm3.weight, norm3.bias)
    assert out3.shape == x3.shape
    assert jnp.max(jnp.abs(out3 - ref3)) < 2e-4

    print("KERNEL_OK")
</pallas_src>

<mosaic_0001>
module attributes {stable_mosaic.version = 11 : i64} {
  func.func @_fused_kernel(%arg0: i32, %arg1: memref<4x128xf32, #tpu.memory_space<vmem>>, %arg2: memref<1x32xf32, #tpu.memory_space<vmem>>, %arg3: memref<1x32xf32, #tpu.memory_space<vmem>>, %arg4: memref<4x128xf32, #tpu.memory_space<vmem>>) attributes {dimension_semantics = [#tpu.dimension_semantics<arbitrary>], iteration_bounds = array<i64: 1>, scalar_prefetch = 0 : i64, scratch_operands = 0 : i64, tpu.core_type = #tpu.core_type<tc>, window_params = [{pipeline_mode = #tpu.pipeline_mode<synchronous>, transform_indices = @transform_0, window_bounds = array<i64: 4, 128>}, {pipeline_mode = #tpu.pipeline_mode<synchronous>, transform_indices = @transform_1, window_bounds = array<i64: 1, 32>}, {pipeline_mode = #tpu.pipeline_mode<synchronous>, transform_indices = @transform_2, window_bounds = array<i64: 1, 32>}, {pipeline_mode = #tpu.pipeline_mode<synchronous>, transform_indices = @transform_3, window_bounds = array<i64: 4, 128>}]} {
    %c0 = arith.constant 0 : index
    %c0_0 = arith.constant 0 : index
    %0 = vector.load %arg1[%c0, %c0_0] : memref<4x128xf32, #tpu.memory_space<vmem>>, vector<4x128xf32>
    %cst = arith.constant dense<0.000000e+00> : vector<128xf32>
    %1 = vector.multi_reduction <add>, %0, %cst [0] : vector<4x128xf32> to vector<128xf32>
    %2 = vector.shape_cast %1 : vector<128xf32> to vector<1x128xf32>
    %3 = arith.mulf %0, %0 : vector<4x128xf32>
    %cst_1 = arith.constant dense<0.000000e+00> : vector<128xf32>
    %4 = vector.multi_reduction <add>, %3, %cst_1 [0] : vector<4x128xf32> to vector<128xf32>
    %5 = vector.shape_cast %4 : vector<128xf32> to vector<1x128xf32>
    %c0_2 = arith.constant 0 : index
    %c0_3 = arith.constant 0 : index
    %6 = vector.load %arg2[%c0_2, %c0_3] : memref<1x32xf32, #tpu.memory_space<vmem>>, vector<1x32xf32>
    %c0_4 = arith.constant 0 : index
    %c0_5 = arith.constant 0 : index
    %7 = vector.load %arg3[%c0_4, %c0_5] : memref<1x32xf32, #tpu.memory_space<vmem>>, vector<1x32xf32>
    %8 = vector.extract_strided_slice %2 {offsets = [0, 0], sizes = [1, 32], strides = [1, 1]} : vector<1x128xf32> to vector<1x32xf32>
    %9 = vector.extract_strided_slice %5 {offsets = [0, 0], sizes = [1, 32], strides = [1, 1]} : vector<1x128xf32> to vector<1x32xf32>
    %10 = vector.extract_strided_slice %2 {offsets = [0, 32], sizes = [1, 32], strides = [1, 1]} : vector<1x128xf32> to vector<1x32xf32>
    %11 = arith.addf %8, %10 : vector<1x32xf32>
    %12 = vector.extract_strided_slice %5 {offsets = [0, 32], sizes = [1, 32], strides = [1, 1]} : vector<1x128xf32> to vector<1x32xf32>
    %13 = arith.addf %9, %12 : vector<1x32xf32>
    %14 = vector.extract_strided_slice %2 {offsets = [0, 64], sizes = [1, 32], strides = [1, 1]} : vector<1x128xf32> to vector<1x32xf32>
    %15 = arith.addf %11, %14 : vector<1x32xf32>
    %16 = vector.extract_strided_slice %5 {offsets = [0, 64], sizes = [1, 32], strides = [1, 1]} : vector<1x128xf32> to vector<1x32xf32>
    %17 = arith.addf %13, %16 : vector<1x32xf32>
    %18 = vector.extract_strided_slice %2 {offsets = [0, 96], sizes = [1, 32], strides = [1, 1]} : vector<1x128xf32> to vector<1x32xf32>
    %19 = arith.addf %15, %18 : vector<1x32xf32>
    %20 = vector.extract_strided_slice %5 {offsets = [0, 96], sizes = [1, 32], strides = [1, 1]} : vector<1x128xf32> to vector<1x32xf32>
    %21 = arith.addf %17, %20 : vector<1x32xf32>
    %cst_6 = arith.constant 6.250000e-02 : f32
    %22 = vector.broadcast %cst_6 : f32 to vector<1x32xf32>
    %23 = arith.mulf %19, %22 : vector<1x32xf32>
    %cst_7 = arith.constant 6.250000e-02 : f32
    %24 = vector.broadcast %cst_7 : f32 to vector<1x32xf32>
    %25 = arith.mulf %21, %24 : vector<1x32xf32>
    %26 = arith.mulf %23, %23 : vector<1x32xf32>
    %27 = arith.subf %25, %26 : vector<1x32xf32>
    %cst_8 = arith.constant 0.000000e+00 : f32
    %28 = vector.broadcast %cst_8 : f32 to vector<1x32xf32>
    %29 = arith.maximumf %27, %28 : vector<1x32xf32>
    %cst_9 = arith.constant 9.99999974E-6 : f32
    %30 = vector.broadcast %cst_9 : f32 to vector<1x32xf32>
    %31 = arith.addf %29, %30 : vector<1x32xf32>
    %32 = math.rsqrt %31 : vector<1x32xf32>
    %33 = arith.mulf %6, %32 : vector<1x32xf32>
    %34 = arith.mulf %23, %33 : vector<1x32xf32>
    %35 = arith.subf %7, %34 : vector<1x32xf32>
    %36 = tpu.concatenate %33, %33, %33, %33 in 1 : vector<1x32xf32>, vector<1x32xf32>, vector<1x32xf32>, vector<1x32xf32> -> vector<1x128xf32>
    %37 = tpu.concatenate %35, %35, %35, %35 in 1 : vector<1x32xf32>, vector<1x32xf32>, vector<1x32xf32>, vector<1x32xf32> -> vector<1x128xf32>
    %38 = vector.broadcast %36 : vector<1x128xf32> to vector<4x128xf32>
    %39 = arith.mulf %0, %38 : vector<4x128xf32>
    %40 = vector.broadcast %37 : vector<1x128xf32> to vector<4x128xf32>
    %41 = arith.addf %39, %40 : vector<4x128xf32>
    %c0_10 = arith.constant 0 : index
    %c0_11 = arith.constant 0 : index
    %42 = vector.load %arg4[%c0_10, %c0_11] : memref<4x128xf32, #tpu.memory_space<vmem>>, vector<4x128xf32>
    tpu.vector_store %arg4[%c0_10, %c0_11], %41 {strides = array<i32>} : memref<4x128xf32, #tpu.memory_space<vmem>>, vector<4x128xf32>,
    return
  }
  func.func @transform_0(%arg0: i32) -> (i32, i32) {
    %c0_i32 = arith.constant 0 : i32
    %c0_i32_0 = arith.constant 0 : i32
    %c0_i32_1 = arith.constant 0 : i32
    return %c0_i32, %c0_i32_0 : i32, i32
  }
  func.func @transform_1(%arg0: i32) -> (i32, i32) {
    %c0_i32 = arith.constant 0 : i32
    %c0_i32_0 = arith.constant 0 : i32
    %c0_i32_1 = arith.constant 0 : i32
    return %c0_i32, %c0_i32_0 : i32, i32
  }
  func.func @transform_2(%arg0: i32) -> (i32, i32) {
    %c0_i32 = arith.constant 0 : i32
    %c0_i32_0 = arith.constant 0 : i32
    %c0_i32_1 = arith.constant 0 : i32
    return %c0_i32, %c0_i32_0 : i32, i32
  }
  func.func @transform_3(%arg0: i32) -> (i32, i32) {
    %c0_i32 = arith.constant 0 : i32
    %c0_i32_0 = arith.constant 0 : i32
    %c0_i32_1 = arith.constant 0 : i32
    return %c0_i32, %c0_i32_0 : i32, i32
  }
}

</mosaic_0001>

<bundles_post_ra>
// kernel: tpu_custom_call.1
= control target key start
LH: loop header
LB: loop body
LE: loop exit
PB: predicated region body
PF: predicated region fallthrough
CT: control target
= control target key end

     0   :  { %8 = vsyncpa [#allocation3], 0  ;;  %s303_s0 = inlined_call_operand.hbm [shape: f32[4,128], index: 0, kind: input, shape index: {}]   ;;  %s304_s1 = inlined_call_operand.hbm [shape: f32[1,32], index: 1, kind: input, shape index: {}]   ;;  %s305_s2 = inlined_call_operand.vmem [shape: f32[1,32], index: 2, kind: input, shape index: {}]   ;;  %s306_s3 = inlined_call_operand.hbm [shape: f32[4,128], index: 3, kind: output, shape index: {}]  }
   0x1   :  { %9 = vsyncpa [#allocation6], 0 }
   0x2   :  { %10 = vsyncpa [#allocation4], 0  ;;  %s16_s14 = sshll.u32 %s303_s0, 4  ;;  %s247_s15 = smov [#allocation2]   ;;  %s17_s14 = int_to_ptr.hbm [resolvable:$true] %s16_s14 }
   0x3   :  { %s18_s16 = sshll.u32 %s247_s15, 4  ;;  %s27_s19 = sshll.u32 %s304_s1, 4  ;;  %s19_s16 = int_to_ptr.vmem [resolvable:$true] %s18_s16  ;;  %s28_s19 = int_to_ptr.hbm [resolvable:$true] %s27_s19 }
   0x4   :  { %21 = dma.hbm_to_vmem [thread:$0]  %s17_s14, 64, %s19_s16, [#allocation3]  }
   0x5   :  { %s248_s20 = smov [#allocation5]  }
   0x6   :  { %s29_s21 = sshll.u32 %s248_s20, 4  ;;  %s30_s21 = int_to_ptr.vmem [resolvable:$true] %s29_s21 }
   0x7   :  { %32 = dma.hbm_to_vmem [thread:$0]  %s28_s19, 16, %s30_s21, [#allocation6]  }
   0x8   :  { %241 = dma.done.wait [#allocation3], 64  }
   0x9   :  { %242 = vsyncadd [#allocation3], 4294967232 }
   0xa   :  { %243 = dma.done.wait [#allocation6], 16  }
   0xb   :  { %244 = vsyncadd [#allocation6], 4294967280  ;;  %vm44_vm0 = vcmask 1043456   ;;  %v279_v0 = vld [vmem:[#allocation2] sm:$0xf]  ;;  %s249_s0 = smov 96  }
   0xc   :  { %v45_v1 = vsel %vm44_vm0, %v279_v0, 0.0  ;;  %v52_v2 = vmul.f32 %v279_v0, %v279_v0  ;;  %s250_s1 = smov 64   ;;  %s251_s22 = smov 32   ;;  %v60_v40 = vld [vmem:[#allocation5] sm:$0x1]  ;;  %vm118_vm4 = vcmask 261120  }
   0xd   :  { %v46_v3 = vrot.slane %v45_v1, 4  ;;  %v61_v45 = vld [vmem:[%s305_s2] sm:$0x1]  ;;  %vm120_vm5 = vcmask 523264   ;;  %vm122_vm6 = vcmask 785408   ;;  %s252_s2 = smov [#allocation7]  }
   0xe   :  { %v53_v4 = vsel %vm44_vm0, %v52_v2, 0.0  ;;  %s148_s25 = sshll.u32 %s252_s2, 4  ;;  %s150_s28 = sshll.u32 %s306_s3, 4  ;;  %s149_s25 = int_to_ptr.vmem [resolvable:$true] %s148_s25  ;;  %s151_s28 = int_to_ptr.hbm [resolvable:$true] %s150_s28 }
   0xf   :  { %v47_v5 = vadd.f32 %v46_v3, %v45_v1  ;;  %v54_v6 = vrot.slane %v53_v4, 4 }
  0x11   :  { %v48_v7 = vrot.slane %v47_v5, 2  ;;  %v55_v8 = vadd.f32 %v54_v6, %v53_v4 }
  0x13   :  { %v49_v9 = vadd.f32 %v48_v7, %v47_v5  ;;  %v56_v10 = vrot.slane %v55_v8, 2 }
  0x15   :  { %v50_v11 = vrot.slane %v49_v9, 1  ;;  %v57_v12 = vadd.f32 %v56_v10, %v55_v8 }
  0x17   :  { %v51_v13 = vadd.f32 %v50_v11, %v49_v9  ;;  %v58_v14 = vrot.slane %v57_v12, 1 }
  0x19   :  { %63 = vrot.lane.b32.xlu0 %v51_v13, %s249_s0  ;;  %72 = vrot.lane.b32.xlu1 %v51_v13, %s250_s1  ;;  %v59_v15 = vadd.f32 %v58_v14, %v57_v12 }
  0x1a   :  { %80 = vrot.lane.b32.xlu2 %v51_v13, %s251_s22 }
  0x21   :  { %68 = vrot.lane.b32.xlu0 %v59_v15, %s249_s0  ;;  %76 = vrot.lane.b32.xlu1 %v59_v15, %s250_s1 }
  0x22   :  { %84 = vrot.lane.b32.xlu2 %v59_v15, %s251_s22 }
  0x74   :  { %v81_v16 = vpop.permute.xlu2 %80 }
  0x7c   :  { %v85_v25 = vpop.permute.xlu2 %84 }
  0x8b   :  { %v64_v17 = vpop.permute.xlu0 %63  ;;  %v73_v18 = vpop.permute.xlu1 %72 }
  0x8c   :  { %v66_v19 = vadd.f32 %v64_v17, %v51_v13 }
  0x8e   :  { %v75_v20 = vadd.f32 %v73_v18, %v66_v19 }
  0x90   :  { %v83_v21 = vadd.f32 %v81_v16, %v75_v20 }
  0x92   :  { %v88_v26 = vmul.f32 0.0625, %v83_v21 }
  0x93   :  { %v69_v22 = vpop.permute.xlu0 %68  ;;  %v77_v23 = vpop.permute.xlu1 %76 }
  0x94   :  { %v71_v24 = vadd.f32 %v69_v22, %v59_v15  ;;  %v90_v29 = vmul.f32 %v88_v26, %v88_v26 }
  0x96   :  { %v79_v27 = vadd.f32 %v77_v23, %v71_v24 }
  0x98   :  { %v87_v28 = vadd.f32 %v85_v25, %v79_v27 }
  0x9a   :  { %v89_v30 = vmul.f32 0.0625, %v87_v28 }
  0x9c   :  { %v91_v31 = vsub.f32 %v89_v30, %v90_v29 }
  0x9e   :  { %v92_v32 = vmax.f32 %v91_v31, 0.0 }
  0xa0   :  { %v93_v33 = vadd.f32 1e-05, %v92_v32 }
  0xa2   :  { %167 = vrsqrt.f32 %v93_v33  ;;  %vm100_vm2 = vweird.f32 %v93_v33 }
  0xa8   :  { %v168_v34 = vpop.eup %167 }
  0xa9   :  { %v95_v35 = vmul.f32 %v168_v34, %v93_v33  ;;  %vm101_vm1 = vweird.f32 %v168_v34 }
  0xaa   :  { %vm102_vm3 = vmor %vm100_vm2, %vm101_vm1 }
  0xab   :  { %v96_v36 = vmul.f32 %v168_v34, %v95_v35 }
  0xad   :  { %v97_v37 = vmul.f32 0.5, %v96_v36 }
  0xaf   :  { %v98_v38 = vsub.f32 1.5, %v97_v37 }
  0xb1   :  { %v99_v39 = vmul.f32 %v168_v34, %v98_v38 }
  0xb3   :  { %v103_v41 = vsel %vm102_vm3, %v168_v34, %v99_v39 }
  0xb4   :  { %v104_v42 = vmul.f32 %v103_v41, %v60_v40 }
  0xb6   :  { %v108_v43 = vperm.slane %v104_v42, 0  ;;  %v105_v44 = vmul.f32 %v104_v42, %v88_v26 }
  0xb8   :  { %115 = vrot.lane.b32.xlu2 %v108_v43, %s249_s0  ;;  %112 = vrot.lane.b32.xlu1 %v108_v43, %s250_s1  ;;  %v106_v46 = vsub.f32 %v61_v45, %v105_v44 }
  0xb9   :  { %109 = vrot.lane.b32.xlu0 %v108_v43, %s251_s22 }
  0xba   :  { %v125_v47 = vperm.slane %v106_v46, 0 }
  0xc0   :  { %132 = vrot.lane.b32.xlu2 %v125_v47, %s249_s0  ;;  %129 = vrot.lane.b32.xlu1 %v125_v47, %s250_s1 }
  0xc1   :  { %126 = vrot.lane.b32.xlu0 %v125_v47, %s251_s22 }
 0x112   :  { %v116_v49 = vpop.permute.xlu2 %115 }
 0x11a   :  { %v133_v58 = vpop.permute.xlu2 %132 }
 0x12a   :  { %v113_v48 = vpop.permute.xlu1 %112 }
 0x12b   :  { %v110_v50 = vpop.permute.xlu0 %109 }
 0x12c   :  { %v119_v51 = vsel %vm118_vm4, %v104_v42, %v110_v50 }
 0x12d   :  { %v121_v52 = vsel %vm120_vm5, %v119_v51, %v113_v48 }
 0x12e   :  { %v123_v53 = vsel %vm122_vm6, %v121_v52, %v116_v49 }
 0x12f   :  { %v138_v55 = vperm.slane %v123_v53, 0 }
 0x131   :  { %v139_v62 = vmul.f32 %v138_v55, %v279_v0 }
 0x132   :  { %v130_v54 = vpop.permute.xlu1 %129 }
 0x133   :  { %v127_v56 = vpop.permute.xlu0 %126 }
 0x134   :  { %v135_v57 = vsel %vm118_vm4, %v106_v46, %v127_v56 }
 0x135   :  { %v136_v59 = vsel %vm120_vm5, %v135_v57, %v130_v54 }
 0x136   :  { %v137_v60 = vsel %vm122_vm6, %v136_v59, %v133_v58 }
 0x137   :  { %v140_v61 = vperm.slane %v137_v60, 0 }
 0x139   :  { %v141_v63 = vadd.f32 %v140_v61, %v139_v62 }
 0x13b   :  { %142 = vst [vmem:[#allocation7] sm:$0xf] %v141_v63 }
 0x13c   :  { %153 = dma.vmem_to_hbm [thread:$0]  %s149_s25, 64, %s151_s28, [#allocation4]  }
 0x13d   :  { %245 = dma.done.wait [#allocation4], 64  }
 0x13e   :  { %246 = vsyncadd [#allocation4], 4294967232 }
 0x13f   :  { %158 = vsyncpa [#allocation3], 1 }
 0x140   :  { %159 = vsyncpa [#allocation6], 1 }
 0x141   :  { %160 = vsyncpa [#allocation4], 1 }

</bundles_post_ra>
